<compile_context>
chip_gen: v6e
topology: v6e:2x2x1
jax: 0.10.0
libtpu: 0.0.40
codegen_flags: <defaults>
</compile_context>

<pallas_src>
import functools

import jax
import jax.numpy as jnp
from jax import lax
from jax.experimental import pallas as pl
from jax.experimental.pallas import tpu as pltpu


# --------------------------------------------------------------------------- #
# Kernel body: one grid step = one (batch, query-tile).  Refs are 2D.
# --------------------------------------------------------------------------- #
def _scaled_dot_attn_kernel(q_ref, k_ref, v_ref, o_ref, s_ref, *, scale,
                            bf16_softmax):
    q = q_ref[...]                                   # (TQ, d_model), input dtype
    k = k_ref[...]                                   # (Sk, d_model), input dtype
    v = v_ref[...]                                   # (Sk, d_v),     input dtype

    # Fold 1/sqrt(d_k) into q (Sq*d multiplies instead of Sq*Sk).
    qs = q * jnp.asarray(scale, dtype=q.dtype)

    # logits = q @ k^T without materializing a transpose: contract last dims.
    logits = lax.dot_general(
        qs, k,
        dimension_numbers=(((1,), (1,)), ((), ())),
        preferred_element_type=jnp.float32,
    )                                                # (TQ, Sk) f32

    # Numerically stable softmax over the key axis.
    m = jnp.max(logits, axis=-1, keepdims=True)      # f32 row max
    x = logits - m
    if bf16_softmax:
        # v6e/v7x: bf16-capable VPU/EUP -> run the elementwise chain in bf16,
        # keep only the row-sum accumulation in f32.
        x = x.astype(jnp.bfloat16)
    e = jnp.exp(x)
    denom = jnp.sum(e, axis=-1, keepdims=True, dtype=jnp.float32)
    inv = pl.reciprocal(denom, approx=True)          # EUP slot, ~free

    # Single low-precision cast, reused for BOTH the scores store and the
    # P@V matmul (s_ref.dtype == v.dtype == input dtype).
    p = (e * inv.astype(e.dtype)).astype(s_ref.dtype)   # (TQ, Sk)

    s_ref[...] = p                                        # SCORE_SAVER.save
    o_ref[...] = jnp.dot(p, v,
                         preferred_element_type=jnp.float32).astype(o_ref.dtype)


# --------------------------------------------------------------------------- #
# Resource planning helpers
# --------------------------------------------------------------------------- #
def _kv_single_buffer_supported():
    """Probe whether BlockSpec(pipeline_mode=pl.Buffered(1)) is available."""
    try:
        pl.BlockSpec((8, 128), lambda i: (i, 0), pipeline_mode=pl.Buffered(1))
        return True
    except Exception:  # pragma: no cover - older jax
        return False


def _has_bf16_vpu():
    """bf16 VPU/EUP chips (v6e / v7x).  v5e has no bf16 vector units."""
    try:
        kind = jax.devices()[0].device_kind.lower()
    except Exception:  # pragma: no cover
        return False
    return ("v6" in kind) or ("v7" in kind) or ("7x" in kind)


def _plan_tiling(Sq, Sk, d_model, d_v, in_bytes, score_bytes, kv_buffers):
    """Pick (tq, n_q_tiles, sq_pad, vmem_limit) from a per-step byte budget."""
    try:
        vmem_cap = pltpu.get_tpu_info().vmem_capacity_bytes
    except Exception:  # pragma: no cover - conservative fallback (v7x-sized)
        vmem_cap = 64 * 1024 * 1024

    # v5e/v6e (128 MiB physical) -> 96 MiB scoped; v7x (64 MiB) -> ~52 MiB
    # instead of the 32 MiB default, which leaves half the chip unused.
    vmem_limit = (96 << 20) if vmem_cap >= (96 << 20) else (52 << 20)
    budget = int(0.70 * vmem_limit)

    # Fixed footprint: k/v blocks (single-buffered when pl.Buffered(1) works).
    fixed = kv_buffers * Sk * (d_model + d_v) * in_bytes
    # Per-query-row footprint: double-buffered q/out/scores tiles plus ~3
    # (tq, Sk) f32-equivalent softmax temporaries (logits / exp / probs).
    per_row = (2 * d_model * in_bytes
               + 2 * d_v * in_bytes
               + 2 * Sk * score_bytes
               + 3 * Sk * 4)
    tq_cap = (budget - fixed) // per_row if budget > fixed else 8
    tq_cap = int(max(8, min(tq_cap, 1024)))   # >~1024 rows: no extra roofline win

    if Sq <= tq_cap:
        return Sq, 1, Sq, vmem_limit          # single tile, no padding

    # Prefer a tile that divides Sq exactly (no pad -> no post-kernel slice,
    # which would be a full extra O(B*Sq*Sk) HBM pass over the scores).
    t = (tq_cap // 8) * 8
    while t >= 8:
        if Sq % t == 0:
            return t, Sq // t, Sq, vmem_limit
        t -= 8

    # Fallback: pad Sq (padded rows computed + sliced off afterwards).
    tq = max(8, (tq_cap // 8) * 8)
    sq_pad = pl.cdiv(Sq, tq) * tq
    return tq, sq_pad // tq, sq_pad, vmem_limit


def _cost_estimate(B, Sq, Sk, d_model, d_v, in_bytes, score_bytes):
    try:
        return pl.CostEstimate(
            flops=2 * B * Sq * Sk * (d_model + d_v),
            transcendentals=B * Sq * Sk,
            bytes_accessed=(B * Sq * d_model * in_bytes      # q
                            + B * Sk * d_model * in_bytes    # k
                            + B * Sk * d_v * in_bytes        # v
                            + B * Sq * d_v * in_bytes        # outputs
                            + B * Sq * Sk * score_bytes),    # scores
        )
    except Exception:  # pragma: no cover
        return None


# --------------------------------------------------------------------------- #
# Public wrapper
# --------------------------------------------------------------------------- #
def scaled_dot_attention(q, k, v):
    """Pallas scaled dot-product attention.

    q: (B, Sq, d_model), k: (B, Sk, d_model), v: (B, Sk, d_v)
    returns (outputs (B, Sq, d_v), scores (B, Sq, Sk))
    """
    B, Sq, d_model = q.shape
    Bk, Sk, d_model_k = k.shape
    Bv, Skv, d_v = v.shape
    assert B == Bk == Bv and Sk == Skv and d_model == d_model_k

    in_bytes = jnp.dtype(q.dtype).itemsize
    scores_dtype = q.dtype                 # scores in input dtype: halves the
    score_bytes = jnp.dtype(scores_dtype).itemsize  # dominant HBM writeback for bf16

    kv_single = _kv_single_buffer_supported()
    kv_buffers = 1 if kv_single else 2

    tq, n_q_tiles, sq_pad, vmem_limit = _plan_tiling(
        Sq, Sk, d_model, d_v, in_bytes, score_bytes, kv_buffers)

    q_in = q
    if sq_pad != Sq:
        q_in = jnp.pad(q, ((0, 0), (0, sq_pad - Sq), (0, 0)))

    bf16_softmax = (q.dtype == jnp.bfloat16) and _has_bf16_vpu()

    kernel = functools.partial(
        _scaled_dot_attn_kernel,
        scale=1.0 / float(d_model) ** 0.5,
        bf16_softmax=bf16_softmax,
    )

    # k/v index_maps are independent of the q-tile index i: blocks are re-used
    # (not re-DMA'd) across query tiles, only refreshed at batch boundaries.
    def _kv_spec(block_shape, index_map):
        if kv_single:
            return pl.BlockSpec(block_shape, index_map,
                                pipeline_mode=pl.Buffered(1))
        return pl.BlockSpec(block_shape, index_map)

    grid_spec = pltpu.PrefetchScalarGridSpec(
        num_scalar_prefetch=0,
        grid=(B, n_q_tiles),
        in_specs=[
            pl.BlockSpec((None, tq, d_model), lambda b, i: (b, i, 0)),
            _kv_spec((None, Sk, d_model), lambda b, i: (b, 0, 0)),
            _kv_spec((None, Sk, d_v), lambda b, i: (b, 0, 0)),
        ],
        out_specs=[
            pl.BlockSpec((None, tq, d_v), lambda b, i: (b, i, 0)),
            pl.BlockSpec((None, tq, Sk), lambda b, i: (b, i, 0)),
        ],
    )

    out_shapes = (
        jax.ShapeDtypeStruct((B, sq_pad, d_v), q.dtype),
        jax.ShapeDtypeStruct((B, sq_pad, Sk), scores_dtype),
    )

    outputs, scores = pl.pallas_call(
        kernel,
        out_shape=out_shapes,
        grid_spec=grid_spec,
        compiler_params=pltpu.CompilerParams(
            dimension_semantics=("parallel", "parallel"),
            vmem_limit_bytes=vmem_limit,
        ),
        cost_estimate=_cost_estimate(B, sq_pad, Sk, d_model, d_v,
                                     in_bytes, score_bytes),
    )(q_in, k, v)

    if sq_pad != Sq:
        outputs = outputs[:, :Sq, :]
        scores = scores[:, :Sq, :]
    return outputs, scores


# --------------------------------------------------------------------------- #
# Pure-JAX reference + self-test
# --------------------------------------------------------------------------- #
def _reference(q, k, v):
    d_k = q.shape[-1]
    logits = jnp.einsum(
        "bqd,bkd->bqk",
        q.astype(jnp.float32),
        k.astype(jnp.float32),
    ) / jnp.sqrt(jnp.float32(d_k))
    scores = jax.nn.softmax(logits, axis=-1)
    out = jnp.einsum("bqk,bkd->bqd", scores, v.astype(jnp.float32))
    return out, scores


if __name__ == "__main__":
    key = jax.random.PRNGKey(0)
    kq, kk, kv = jax.random.split(key, 3)

    B, Sq, Sk, d_model, d_v = 2, 8, 8, 32, 32
    q = jax.random.normal(kq, (B, Sq, d_model), dtype=jnp.float32)
    k = jax.random.normal(kk, (B, Sk, d_model), dtype=jnp.float32)
    v = jax.random.normal(kv, (B, Sk, d_v), dtype=jnp.float32)

    # f32 path
    outputs, scores = scaled_dot_attention(q, k, v)
    jax.block_until_ready((outputs, scores))

    ref_out, ref_scores = _reference(q, k, v)
    assert outputs.shape == (B, Sq, d_v)
    assert scores.shape == (B, Sq, Sk)
    # approx reciprocal in the softmax denominator -> slightly widened tolerance
    assert jnp.allclose(outputs, ref_out, atol=5e-3, rtol=5e-3)
    assert jnp.allclose(scores, ref_scores, atol=5e-3, rtol=5e-3)

    # bf16 path (native MXU operands; bf16 softmax chain on v6e/v7x)
    qb, kb, vb = (x.astype(jnp.bfloat16) for x in (q, k, v))
    out_b, sc_b = scaled_dot_attention(qb, kb, vb)
    jax.block_until_ready((out_b, sc_b))
    assert out_b.dtype == jnp.bfloat16 and sc_b.dtype == jnp.bfloat16
    assert jnp.allclose(out_b.astype(jnp.float32), ref_out, atol=5e-2, rtol=5e-2)
    assert jnp.allclose(sc_b.astype(jnp.float32), ref_scores, atol=5e-2, rtol=5e-2)

    print("KERNEL_OK")
</pallas_src>

<mosaic_0001>
module attributes {stable_mosaic.version = 11 : i64} {
  func.func @_scaled_dot_attn_kernel(%arg0: i32, %arg1: i32, %arg2: memref<1x8x32xf32, #tpu.memory_space<vmem>>, %arg3: memref<1x8x32xf32, #tpu.memory_space<vmem>>, %arg4: memref<1x8x32xf32, #tpu.memory_space<vmem>>, %arg5: memref<1x8x32xf32, #tpu.memory_space<vmem>>, %arg6: memref<1x8x8xf32, #tpu.memory_space<vmem>>) attributes {dimension_semantics = [#tpu.dimension_semantics<parallel>, #tpu.dimension_semantics<parallel>], iteration_bounds = array<i64: 2, 1>, scalar_prefetch = 0 : i64, scratch_operands = 0 : i64, tpu.core_type = #tpu.core_type<tc>, window_params = [{transform_indices = @transform_0, window_bounds = array<i64: 1, 8, 32>}, {pipeline_mode = #tpu.pipeline_mode<synchronous>, transform_indices = @transform_1, window_bounds = array<i64: 1, 8, 32>}, {pipeline_mode = #tpu.pipeline_mode<synchronous>, transform_indices = @transform_2, window_bounds = array<i64: 1, 8, 32>}, {transform_indices = @transform_3, window_bounds = array<i64: 1, 8, 32>}, {transform_indices = @transform_4, window_bounds = array<i64: 1, 8, 8>}]} {
    %c0 = arith.constant 0 : index
    %c0_0 = arith.constant 0 : index
    %c0_1 = arith.constant 0 : index
    %0 = vector.load %arg2[%c0, %c0_0, %c0_1] : memref<1x8x32xf32, #tpu.memory_space<vmem>>, vector<1x8x32xf32>
    %1 = vector.shape_cast %0 : vector<1x8x32xf32> to vector<8x32xf32>
    %c0_2 = arith.constant 0 : index
    %c0_3 = arith.constant 0 : index
    %c0_4 = arith.constant 0 : index
    %2 = vector.load %arg3[%c0_2, %c0_3, %c0_4] : memref<1x8x32xf32, #tpu.memory_space<vmem>>, vector<1x8x32xf32>
    %3 = vector.shape_cast %2 : vector<1x8x32xf32> to vector<8x32xf32>
    %c0_5 = arith.constant 0 : index
    %c0_6 = arith.constant 0 : index
    %c0_7 = arith.constant 0 : index
    %4 = vector.load %arg4[%c0_5, %c0_6, %c0_7] : memref<1x8x32xf32, #tpu.memory_space<vmem>>, vector<1x8x32xf32>
    %5 = vector.shape_cast %4 : vector<1x8x32xf32> to vector<8x32xf32>
    %cst = arith.constant 0.176776692 : f32
    %6 = vector.broadcast %cst : f32 to vector<8x32xf32>
    %7 = arith.mulf %1, %6 : vector<8x32xf32>
    %cst_8 = arith.constant dense<0.000000e+00> : vector<8x8xf32>
    %8 = tpu.matmul %7, %3, %cst_8 {dimension_numbers = #tpu.dot_dimension_numbers<[1], [1], [0], [0], [0, 0, 1, 0], [], []>} : vector<8x32xf32>, vector<8x32xf32>, vector<8x8xf32> -> vector<8x8xf32>
    %cst_9 = arith.constant dense<0xFF800000> : vector<8xf32>
    %9 = vector.multi_reduction <maximumf>, %8, %cst_9 [1] : vector<8x8xf32> to vector<8xf32>
    %10 = vector.shape_cast %9 : vector<8xf32> to vector<8x1xf32>
    %11 = vector.broadcast %10 : vector<8x1xf32> to vector<8x8xf32>
    %12 = arith.subf %8, %11 : vector<8x8xf32>
    %13 = math.exp %12 : vector<8x8xf32>
    %cst_10 = arith.constant dense<0.000000e+00> : vector<8xf32>
    %14 = vector.multi_reduction <add>, %13, %cst_10 [1] : vector<8x8xf32> to vector<8xf32>
    %15 = vector.shape_cast %14 : vector<8xf32> to vector<8x1xf32>
    %16 = tpu.reciprocal %15 {approx = true} : vector<8x1xf32> -> vector<8x1xf32>
    %17 = vector.broadcast %16 : vector<8x1xf32> to vector<8x8xf32>
    %18 = arith.mulf %13, %17 : vector<8x8xf32>
    %c0_11 = arith.constant 0 : index
    %c0_12 = arith.constant 0 : index
    %c0_13 = arith.constant 0 : index
    %19 = vector.load %arg6[%c0_11, %c0_12, %c0_13] : memref<1x8x8xf32, #tpu.memory_space<vmem>>, vector<1x8x8xf32>
    %20 = vector.shape_cast %19 : vector<1x8x8xf32> to vector<8x8xf32>
    %21 = vector.shape_cast %18 : vector<8x8xf32> to vector<1x8x8xf32>
    tpu.vector_store %arg6[%c0_11, %c0_12, %c0_13], %21 {strides = array<i32>} : memref<1x8x8xf32, #tpu.memory_space<vmem>>, vector<1x8x8xf32>,
    %cst_14 = arith.constant dense<0.000000e+00> : vector<8x32xf32>
    %22 = tpu.matmul %18, %5, %cst_14 {dimension_numbers = #tpu.dot_dimension_numbers<[1], [0], [0], [1], [0, 0, 1, 1], [], []>} : vector<8x8xf32>, vector<8x32xf32>, vector<8x32xf32> -> vector<8x32xf32>
    %c0_15 = arith.constant 0 : index
    %c0_16 = arith.constant 0 : index
    %c0_17 = arith.constant 0 : index
    %23 = vector.load %arg5[%c0_15, %c0_16, %c0_17] : memref<1x8x32xf32, #tpu.memory_space<vmem>>, vector<1x8x32xf32>
    %24 = vector.shape_cast %23 : vector<1x8x32xf32> to vector<8x32xf32>
    %25 = vector.shape_cast %22 : vector<8x32xf32> to vector<1x8x32xf32>
    tpu.vector_store %arg5[%c0_15, %c0_16, %c0_17], %25 {strides = array<i32>} : memref<1x8x32xf32, #tpu.memory_space<vmem>>, vector<1x8x32xf32>,
    return
  }
  func.func @transform_0(%arg0: i32, %arg1: i32) -> (i32, i32, i32) {
    %c0_i32 = arith.constant 0 : i32
    %c0_i32_0 = arith.constant 0 : i32
    return %arg0, %arg1, %c0_i32 : i32, i32, i32
  }
  func.func @transform_1(%arg0: i32, %arg1: i32) -> (i32, i32, i32) {
    %c0_i32 = arith.constant 0 : i32
    %c0_i32_0 = arith.constant 0 : i32
    %c0_i32_1 = arith.constant 0 : i32
    return %arg0, %c0_i32, %c0_i32_0 : i32, i32, i32
  }
  func.func @transform_2(%arg0: i32, %arg1: i32) -> (i32, i32, i32) {
    %c0_i32 = arith.constant 0 : i32
    %c0_i32_0 = arith.constant 0 : i32
    %c0_i32_1 = arith.constant 0 : i32
    return %arg0, %c0_i32, %c0_i32_0 : i32, i32, i32
  }
  func.func @transform_3(%arg0: i32, %arg1: i32) -> (i32, i32, i32) {
    %c0_i32 = arith.constant 0 : i32
    %c0_i32_0 = arith.constant 0 : i32
    return %arg0, %arg1, %c0_i32 : i32, i32, i32
  }
  func.func @transform_4(%arg0: i32, %arg1: i32) -> (i32, i32, i32) {
    %c0_i32 = arith.constant 0 : i32
    %c0_i32_0 = arith.constant 0 : i32
    return %arg0, %arg1, %c0_i32 : i32, i32, i32
  }
}

</mosaic_0001>

<bundles_post_ra>
// kernel: tpu_custom_call.1
= control target key start
LH: loop header
LB: loop body
LE: loop exit
PB: predicated region body
PF: predicated region fallthrough
CT: control target
= control target key end

     0   :  { %10 = vsyncpa [#allocation3], 0  ;;  %s1221_s0 = inlined_call_operand.hbm [shape: f32[2,8,32], index: 0, kind: input, shape index: {}]   ;;  %s1222_s1 = inlined_call_operand.hbm [shape: f32[2,8,32], index: 1, kind: input, shape index: {}]   ;;  %s1223_s2 = inlined_call_operand.hbm [shape: f32[2,8,32], index: 2, kind: input, shape index: {}]   ;;  %s1224_s3 = inlined_call_operand.hbm [shape: f32[2,8,32], index: 3, kind: output, shape index: {0}]   ;;  %s1225_s4 = inlined_call_operand.hbm [shape: f32[2,8,8], index: 4, kind: output, shape index: {1}]  }
   0x1   :  { %12 = vsyncpa [#allocation3 + $0x1], 0 }
   0x2   :  { %13 = vsyncpa [#allocation6], 0 }
   0x3   :  { %14 = vsyncpa [#allocation4], 0 }
   0x4   :  { %16 = vsyncpa [#allocation4 + $0x1], 0 }
   0x5   :  { %17 = vsyncpa [#allocation10], 0 }
   0x6   :  { %19 = vsyncpa [#allocation10 + $0x1], 0  ;;  %s973_s15 = smov 0   ;;  %s975_s16 = smov 0  }
   0x7   :  { %s977_s17 = smov 0   ;;  %s979_s18 = smov 0  }
   0x8   :  { %s981_s19 = smov 0   ;;  %s983_s20 = smov 0  }
   0x9 LB: > { %s620_s21 = sadd.s32 4294967295, %s939_s20   ;;  %s621_s22 = sadd.s32 4294967294, %s939_s20   ;;  %s939_s20 = sphi %s983_s20, %s25_s20   ;;  %s935_s19 = sphi %s981_s19, %s1245_s19   ;;  %s931_s18 = sphi %s979_s18, %s1244_s18   ;;  %s927_s17 = sphi %s977_s17, %s1243_s17   ;;  %s923_s16 = sphi %s975_s16, %s1242_s16   ;;  %s919_s15 = sphi %s973_s15, %s1241_s15  }
   0xa   : > { %p59_p0 = scmp.ne.s32.totalorder %s923_s16, %s919_s15  ;;  %p60_p1 = scmp.eq.s32.totalorder %s620_s21, 0 }
   0xb   : > { %p1005_p2 = scmp.eq.s32.totalorder %s620_s21, 1  ;;  %p143_p3 = scmp.eq.s32.totalorder %s621_s22, 1 }
   0xc   : > { %p1009_p4 = por %p60_p1, %p59_p0  ;;  %p622_p5 = scmp.ge.s32.totalorder %s939_s20, 1 }
   0xd   : > { %s1229_s23 = scalar_select %p1005_p2, 1, 0 }
   0xe   : > { %s1230_s24 = scalar_select %p1009_p4, 1, 0 }
   0xf   : > { %p1014_p6 = por %p143_p3, %p59_p0  ;;  %p178_p7 = scmp.lt.s32.totalorder %s939_s20, 3 }
  0x10   : > { %s1019_s26 = sshll.u32 %s931_s18, 7  ;;  %s941_s5 = smov [#allocation5]  }
  0x11   : > { %s1231_s25 = scalar_select %p1014_p6, 1, 0 }
  0x12   : > { %p1021_p8 = pnand %p622_p5, %p178_p7  ;;  %s1029_s30 = scalar_lea.hbm %s1222_s1, %s1019_s26 }
  0x13   : > { %s193_s6 = sshll.u32 %s941_s5, 4  ;;  %s1038_s9 = scalar_lea.hbm %s1223_s2, %s1019_s26  ;;  %s194_s6 = int_to_ptr.vmem [resolvable:$true] %s193_s6 }
  0x14   : > { %s1232_s27 = scalar_select %p1021_p8, 1, 0 }
  0x15   : > { %p665_p10 = pneg %p1021_p8  ;;  %s942_s11 = smov [#allocation7]  }
  0x16   : > { %s206_s12 = sshll.u32 %s942_s11, 4  ;;  %s741_s13 = scalar_lea.hbm %s1029_s30, 128  ;;  %s1046_s12 = int_to_ptr.vmem [resolvable:$true] %s206_s12 }
  0x17   : > { %p1042_p11 = pnand %p665_p10, %p1009_p4  ;;  %p742_p12 = scmp.ne.s32.totalorder %s1029_s30, %s741_s13 }
  0x18   : > { %s746_s21 = scalar_lea.hbm %s1222_s1, 256  ;;  %p747_p3 = scmp.lt.s32.totalorder %s1029_s30, %s1222_s1 }
  0x19   : > { %p743_p13 = pneg %p1042_p11  ;;  %p748_p5 = scmp.lt.s32.totalorder %s746_s21, %s741_s13 }
  0x1b   : > { %p744_p0 = pnand %p743_p13, %p742_p12  ;;  %p749_p7 = por %p748_p5, %p747_p3 }
  0x1d   : > { %p745_p1 = pneg %p744_p0 }
  0x1f   : > { %p750_p10 = pnand %p749_p7, %p745_p1 }
  0x21   : > { %753 = shalt.err (!%p750_p10)
}
  0x22   : > { %s754_s29 = scalar_lea.vmem %s194_s6, 128  ;;  %p762_p0 = scmp.lt.s32.totalorder %s194_s6, %s194_s6 }
  0x23   : > { %p755_p9 = scmp.ne.s32.totalorder %s194_s6, %s754_s29  ;;  %p763_p4 = scmp.lt.s32.totalorder %s754_s29, %s754_s29 }
  0x25   : > { %p757_p6 = pnand %p755_p9, %p743_p13  ;;  %p764_p8 = por %p763_p4, %p762_p0 }
  0x27   : > { %p758_p12 = pneg %p757_p6 }
  0x29   : > { %p765_p2 = pnand %p764_p8, %p758_p12 }
  0x2b   : > { %768 = shalt.err (!%p765_p2)
}
  0x2c   : > { %668 = dma.hbm_to_vmem [thread:$0]  (!%p1042_p11), %s1029_s30, 128, %s194_s6, [#allocation6]  }
  0x2d   : > { %s769_s5 = scalar_lea.hbm %s1038_s9, 128  ;;  %s774_s11 = scalar_lea.hbm %s1223_s2, 256 }
  0x2e   : > { %p770_p1 = scmp.ne.s32.totalorder %s1038_s9, %s769_s5  ;;  %p775_p2 = scmp.lt.s32.totalorder %s1038_s9, %s1223_s2 }
  0x2f   : > { %p776_p4 = scmp.lt.s32.totalorder %s774_s11, %s769_s5 }
  0x30   : > { %p772_p3 = pnand %p770_p1, %p743_p13 }
  0x31   : > { %p777_p6 = por %p776_p4, %p775_p2 }
  0x32   : > { %p773_p9 = pneg %p772_p3 }
  0x34   : > { %p778_p8 = pnand %p777_p6, %p773_p9 }
  0x36   : > { %781 = shalt.err (!%p778_p8)
}
  0x37   : > { %s782_s30 = scalar_lea.vmem %s1046_s12, 128  ;;  %p790_p12 = scmp.lt.s32.totalorder %s1046_s12, %s1046_s12 }
  0x38   : > { %p783_p5 = scmp.ne.s32.totalorder %s1046_s12, %s782_s30  ;;  %p791_p0 = scmp.lt.s32.totalorder %s782_s30, %s782_s30 }
  0x3a   : > { %p785_p7 = pnand %p783_p5, %p743_p13  ;;  %p792_p1 = por %p791_p0, %p790_p12 }
  0x3c   : > { %p786_p10 = pneg %p785_p7 }
  0x3e   : > { %p793_p3 = pnand %p792_p1, %p786_p10 }
  0x40   : > { %796 = shalt.err (!%p793_p3)
}
  0x41   : > { %671 = dma.hbm_to_vmem [thread:$0]  (!%p1042_p11), %s1038_s9, 128, %s1046_s12, [#allocation6]  }
  0x42   : > { %s37_s6 = sadd.s32 1, %s935_s19  ;;  %s46_s18 = sadd.s32 1, %s927_s17 }
  0x43   : > { %p39_p13 = scmp.ge.s32.totalorder %s37_s6, 2  ;;  %p53_p9 = scmp.ne.s32.totalorder %s927_s17, %s923_s16 }
  0x44   : > { %p54_p2 = scmp.eq.s32.totalorder %s939_s20, 0  ;;  %p683_p4 = scmp.lt.s32.totalorder %s939_s20, 2 }
  0x45   : > { %s1247_s6 = smov (%p39_p13, %s37_s6), 0  ;;  %p1234_p8 = scmp.ne.s32.totalorder %s1229_s23, 0 }
  0x46   : > { %p55_p6 = por %p54_p2, %p53_p9  ;;  %s41_s21 = ssub.s32 %s935_s19, %s1247_s6 }
  0x47   : > { %p1101_p5 = por %p1234_p8, %p53_p9  ;;  %s217_s22 = sand.u32 1, %s927_s17  }
  0x48   : > { %p44_p7 = scmp.eq.s32.totalorder %s41_s21, 0  ;;  %s626_s9 = sshll.u32 %s217_s22, 3 }
  0x49   : > { %s627_s12 = sshll.u32 %s935_s19, 7  ;;  %s221_s8 = scalar_lea.vmem [#allocation2], %s626_s9 }
  0x4a   : > { %s1110_s28 = scalar_select %p44_p7, %s927_s17, %s46_s18  }
  0x4b   : > { %s227_s7 = scalar_lea.hbm %s1221_s0, %s627_s12  ;;  %s229_s11 = sshll.u32 %s221_s8, 4  ;;  %s230_s11 = int_to_ptr.vmem [resolvable:$true] %s229_s11 }
  0x4c   : > { %p1117_p11 = pnand %p683_p4, %p55_p6  ;;  %s218_s13 = scalar_lea.sflag [#allocation3], %s217_s22 }
  0x4d   : > { %s810_s14 = scalar_lea.vmem %s230_s11, 128  ;;  %s943_s30 = smov [#allocation2]  }
  0x4e   : > { %p799_p10 = pneg %p1117_p11  ;;  %p811_p12 = scmp.ne.s32.totalorder %s230_s11, %s810_s14 }
  0x4f   : > { %s815_s18 = sshll.u32 %s943_s30, 4  ;;  %s816_s18 = int_to_ptr.vmem [resolvable:$false] %s815_s18 }
  0x50   : > { %p813_p0 = pnand %p811_p12, %p799_p10  ;;  %s817_s21 = scalar_lea.vmem %s816_s18, 256 }
  0x51   : > { %p818_p3 = scmp.lt.s32.totalorder %s230_s11, %s816_s18  ;;  %p819_p13 = scmp.lt.s32.totalorder %s817_s21, %s810_s14 }
  0x52   : > { %p814_p1 = pneg %p813_p0 }
  0x53   : > { %p820_p9 = por %p819_p13, %p818_p3 }
  0x55   : > { %p821_p2 = pnand %p820_p9, %p814_p1 }
  0x57   : > { %824 = shalt.err (!%p821_p2)
}
  0x58   : > { %675 = dma.hbm_to_vmem [thread:$0]  (!%p1117_p11), %s227_s7, 128, %s230_s11, %s218_s13  }
  0x59   : > { %p1237_p4 = scmp.ne.s32.totalorder %s1232_s27, 0 }
  0x5a   : > { %s1128_s22 = sand.u32 (!%p1237_p4), 1, %s923_s16   ;;  %p1238_p6 = scmp.ne.s32.totalorder (!%p1237_p4), %s1230_s24, 0 }
  0x5b   : > { %238 = sbr.rel (%p1237_p4) target bundleno = 817 (0x331), region = 32  ;;  %s1131_s9 = sshll.u32 (!%p1237_p4), %s1128_s22, 3 }
  0x5c   : > { %s241_s12 = scalar_lea.sflag (!%p1237_p4), [#allocation3], %s1128_s22  ;;  %s244_s29 = scalar_lea.vmem (!%p1237_p4), [#allocation2], %s1131_s9 }
  0x60   : > { %902 = dma.done.wait (%p1238_p6), %s241_s12, 128  }
  0x61   : > { %904 = vsyncadd (%p1238_p6), %s241_s12, 4294967168 }
  0x62   : > { %906 = dma.done.wait (%p1238_p6), [#allocation6], 256  }
  0x63   : > { %908 = vsyncadd (%p1238_p6), [#allocation6], 4294967040  ;;  %v944_v0 = vmov 0.0   ;;  %vm945_vm0 = vmmov 0   ;;  %vm286_vm1 = vcmask 261120   ;;  %v283_v1 = vld [vmem:[#allocation5] sm:$0xff]  ;;  %s482_s8 = scalar_lea.hbm %s1225_s4, %s1019_s26 }
  0x64   : > { %645 = vmatprep.subr.mxu0 %v944_v0  ;;  %647 = vmatprep.mubr.msk.f32.mxu0 %vm945_vm0, %v944_v0  ;;  %v282_v2 = vld [vmem:[%s244_s29] sm:$0xff]  ;;  %vm363_vm2 = vcmask 64512   ;;  %v284_v12 = vld [vmem:[#allocation7] sm:$0xff]  ;;  %s281_s24 = scalar_lea.vmem [#allocation9], %s1131_s9  ;;  %s456_s11 = scalar_lea.sflag [#allocation10], %s1128_s22 }
  0x65   : > { %650 = vmatprep.subr.mxu1 %v944_v0  ;;  %652 = vmatprep.mubr.msk.f32.mxu1 %vm945_vm0, %v944_v0  ;;  %v285_v3 = vmul.f32 0.17677669, %v282_v2  ;;  %s484_s27 = sshll.u32 %s281_s24, 4  ;;  %s946_s13 = smov [#allocation9]   ;;  %s485_s27 = int_to_ptr.vmem [resolvable:$true] %s484_s27 }
  0x66   : > { %646 = vmatpush3.xpose.msk.msra.mxu0 %vm286_vm1, %v283_v1  ;;  %651 = vmatpush3.msra.mxu1 %v284_v12  ;;  %s825_s23 = scalar_lea.vmem %s485_s27, 128  ;;  %s829_s14 = sshll.u32 %s946_s13, 4  ;;  %s830_s14 = int_to_ptr.vmem [resolvable:$false] %s829_s14 }
  0x67   : > { %p826_p8 = scmp.ne.s32.totalorder %s485_s27, %s825_s23  ;;  %s831_s30 = scalar_lea.vmem %s830_s14, 256 }
  0x68   : > { %p832_p10 = scmp.lt.s32.totalorder %s485_s27, %s830_s14  ;;  %p833_p12 = scmp.lt.s32.totalorder %s831_s30, %s825_s23 }
  0x69   : > { %648 = vmatmul.mubr.msk.f32.vlgmr.msra.gmra.mxu0 %vm286_vm1, %v285_v3  ;;  %p827_p7 = pnand %p826_p8, %p1101_p5 }
  0x6a   : > { %p834_p0 = por %p833_p12, %p832_p10 }
  0x6b   : > { %p828_p11 = pneg %p827_p7 }
  0x6d   : > { %p835_p1 = pnand %p834_p0, %p828_p11 }
 0x129   : > { %v359_v4 = vpop.f32.mrf.mxu0 }
 0x12a   : > { %v364_v5 = vsel %vm363_vm2, %v359_v4, -inf }
 0x12b   : > { %365 = vmax.xlane.f32.xlu0 %v364_v5  ;;  %v649_v6 = vpop.f32.mrf.mxu0 }
 0x1b4   : > { %v366_v7 = vpop.xlane.xlu0 %365 }
 0x1b5   : > { %v367_v8 = vsub.f32 %v359_v4, %v366_v7 }
 0x1b7   : > { %v368_v9 = vmul.f32 1.442695, %v367_v8 }
 0x1b9   : > { %737 = vpow2.f32 %v368_v9 }
 0x1c6   : > { %v738_v10 = vpop.eup %737 }
 0x1c7   : > { %v370_v11 = vsel %vm363_vm2, %v738_v10, 0.0 }
 0x1c8   : > { %371 = vadd.xlane.f32.xlu0 %v370_v11 }
 0x251   : > { %v372_v13 = vpop.xlane.xlu0 %371 }
 0x252   : > { %739 = vrcp.f32 %v372_v13 }
 0x25f   : > { %v740_v14 = vpop.eup %739 }
 0x260   : > { %v374_v15 = vmul.f32 %v740_v14, %v738_v10 }
 0x262   : > { %653 = vmatmul.mubr.msk.f32.vlgmr.msra.gmra.mxu1 %vm363_vm2, %v374_v15  ;;  %375 = vst.msk [vmem:[%s281_s24] sm:$0xff] %vm363_vm2, %v374_v15 }
 0x263   : > { %838 = shalt.err (!%p835_p1)
}
 0x264   : > { %s839_s18 = scalar_lea.hbm %s482_s8, 128  ;;  %s843_s29 = scalar_lea.hbm %s1225_s4, 256 }
 0x265   : > { %p840_p3 = scmp.ne.s32.totalorder %s482_s8, %s839_s18  ;;  %p844_p2 = scmp.lt.s32.totalorder %s482_s8, %s1225_s4 }
 0x266   : > { %p845_p4 = scmp.lt.s32.totalorder %s843_s29, %s839_s18 }
 0x267   : > { %p841_p13 = pnand %p840_p3, %p1101_p5 }
 0x268   : > { %p846_p6 = por %p845_p4, %p844_p2 }
 0x269   : > { %p842_p9 = pneg %p841_p13 }
 0x26b   : > { %p847_p8 = pnand %p846_p6, %p842_p9 }
 0x26d   : > { %850 = shalt.err (!%p847_p8)
}
 0x26e   : > { %662 = dma.vmem_to_hbm [thread:$0]  (%p1101_p5), %s485_s27, 128, %s482_s8, %s456_s11  }
 0x26f   : > { %s274_s7 = scalar_lea.vmem [#allocation8], %s1131_s9  ;;  %s1172_s30 = scalar_lea.hbm %s1224_s3, %s1019_s26 }
 0x270   : > { %s470_s23 = sshll.u32 %s274_s7, 4  ;;  %s451_s18 = scalar_lea.sflag [#allocation4], %s1128_s22  ;;  %s1174_s23 = int_to_ptr.vmem [resolvable:$true] %s470_s23 }
 0x271   : > { %s851_s21 = scalar_lea.vmem %s1174_s23, 128  ;;  %s947_s9 = smov [#allocation8]  }
 0x272   : > { %p852_p7 = scmp.ne.s32.totalorder %s1174_s23, %s851_s21  ;;  %s855_s27 = sshll.u32 %s947_s9, 4  ;;  %s856_s27 = int_to_ptr.vmem [resolvable:$false] %s855_s27 }
 0x273   : > { %s857_s26 = scalar_lea.vmem %s856_s27, 256  ;;  %p858_p12 = scmp.lt.s32.totalorder %s1174_s23, %s856_s27 }
 0x274   : > { %p853_p11 = pnand %p852_p7, %p1101_p5  ;;  %p859_p0 = scmp.lt.s32.totalorder %s857_s26, %s851_s21 }
 0x276   : > { %p854_p10 = pneg %p853_p11  ;;  %p860_p1 = por %p859_p0, %p858_p12 }
 0x278   : > { %p861_p3 = pnand %p860_p1, %p854_p10 }
 0x322   : > { %v445_v16 = vpop.f32.mrf.mxu1 }
 0x323   : > { %449 = vst.msk [vmem:[%s274_s7] sm:$0xff] %vm286_vm1, %v445_v16 }
 0x324   : > { %v654_v17 = vpop.f32.mrf.mxu1 }
 0x325   : > { %864 = shalt.err (!%p861_p3)
}
 0x326   : > { %s865_s8 = scalar_lea.hbm %s1172_s30, 128  ;;  %s869_s12 = scalar_lea.hbm %s1224_s3, 256 }
 0x327   : > { %p866_p13 = scmp.ne.s32.totalorder %s1172_s30, %s865_s8  ;;  %p870_p4 = scmp.lt.s32.totalorder %s1172_s30, %s1224_s3 }
 0x328   : > { %p871_p6 = scmp.lt.s32.totalorder %s869_s12, %s865_s8 }
 0x329   : > { %p867_p9 = pnand %p866_p13, %p1101_p5 }
 0x32a   : > { %p872_p8 = por %p871_p6, %p870_p4 }
 0x32b   : > { %p868_p2 = pneg %p867_p9 }
 0x32d   : > { %p873_p7 = pnand %p872_p8, %p868_p2 }
 0x32f   : > { %876 = shalt.err (!%p873_p7)
}
 0x330   : > { %661 = dma.vmem_to_hbm [thread:$0]  (%p1101_p5), %s1174_s23, 128, %s1172_s30, %s451_s18  }
 0x331 PF: > { %s496_s5 = sand.u32 1, %s919_s15   ;;  %p1239_p11 = scmp.ne.s32.totalorder %s1231_s25, 0 }
 0x332   : > { %p1240_p10 = scmp.ge.s32.totalorder %s939_s20, 2  ;;  %s497_s7 = scalar_lea.sflag [#allocation4], %s496_s5 }
 0x334   : > { %p677_p12 = pnand %p1240_p10, %p1239_p11 }
 0x336   : > { %p678_p0 = pneg %p677_p12 }
 0x338   : > { %910 = dma.done.wait (%p678_p0), %s497_s7, 128  }
 0x339   : > { %912 = vsyncadd (%p678_p0), %s497_s7, 4294967168  ;;  %s506_s13 = scalar_lea.sflag [#allocation10], %s496_s5 }
 0x33a   : > { %914 = dma.done.wait (%p678_p0), %s506_s13, 128  }
 0x33b   : > { %916 = vsyncadd (%p678_p0), %s506_s13, 4294967168  ;;  %s25_s20 = sadd.s32 1, %s939_s20   ;;  %s1241_s15 = smov %s923_s16 }
 0x33c   : > { %p22_p1 = scmp.ge.s32.totalorder %s25_s20, 4   ;;  %s1242_s16 = smov %s927_s17 }
 0x33d   : > { %s1243_s17 = smov %s1110_s28  ;;  %s1244_s18 = smov %s935_s19 }
 0x33e   : > { %s1245_s19 = smov %s1247_s6  ;;  %24 = sbr.rel (!%p22_p1) target bundleno = 9 (0x9), region = 104 }
 0x343   :  { %511 = vsyncpa [#allocation3], 1 }
 0x344   :  { %513 = vsyncpa [#allocation3 + $0x1], 1 }
 0x345   :  { %514 = vsyncpa [#allocation6], 1 }
 0x346   :  { %515 = vsyncpa [#allocation4], 1 }
 0x347   :  { %517 = vsyncpa [#allocation4 + $0x1], 1 }
 0x348   :  { %518 = vsyncpa [#allocation10], 1 }
 0x349   :  { %520 = vsyncpa [#allocation10 + $0x1], 1 }

</bundles_post_ra>
